<compile_context>
chip_gen: v5e
topology: v5e:2x2
jax: 0.10.0
libtpu: 0.0.40
codegen_flags: <defaults>
</compile_context>

<pallas_src>
import math

import jax
import jax.numpy as jnp
from jax.experimental import pallas as pl
from jax.experimental.pallas import tpu as pltpu


def _affine_kernel(x_ref, w_ref, b_ref, o_ref):
    # Elementwise hot path: broadcast the (1, L) parameter row over the
    # (tile_rows, L) activation tile. Compute in f32, cast at the store.
    acc = (x_ref[...].astype(jnp.float32) * w_ref[...].astype(jnp.float32)
           + b_ref[...].astype(jnp.float32))
    o_ref[...] = acc.astype(o_ref.dtype)


def _sublane_pack(dtype):
    # Sublane packing factor: f32 -> 8, bf16 -> 16, int8/fp8 -> 32.
    return {4: 8, 2: 16, 1: 32}.get(jnp.dtype(dtype).itemsize, 8)


def _round_up(n, m):
    return ((n + m - 1) // m) * m


def classifier_forward(x, weight, bias, *, allow_xla_fallback=False):
    """y = x * weight + bias for x of shape (..., dim). Matches Diagonal.forward."""
    orig_shape = x.shape
    D = orig_shape[-1]
    assert weight.shape == (D,) and bias.shape == (D,)

    out_dtype = x.dtype
    itemsize = jnp.dtype(out_dtype).itemsize
    sub = _sublane_pack(out_dtype)

    B = 1
    for s in orig_shape[:-1]:
        B *= s
    total = B * D

    # For tiny tensors the pallas_call launch overhead dwarfs the data movement;
    # let XLA fuse the bare elementwise op instead (opt-in, off by default so
    # the demo below exercises the kernel).
    if allow_xla_fallback and total < (1 << 16):
        return x * weight + bias

    x2 = x.reshape(B, D)
    target_tile_bytes = 2 * 1024 * 1024  # ~2 MiB x-tile per grid step
    lane_ok = (D % 128 == 0)
    lcm = (D * 128) // math.gcd(D, 128)

    if (not lane_ok) and lcm <= 4096:
        # ---- Path A: lane-dense flatten ------------------------------------
        # D under-fills (or misaligns with) the 128-lane vreg width, so every
        # store would be a masked partial vst. Flatten the activations into
        # rows of L lanes where L is a multiple of both 128 (lane-dense) and D
        # (so a jnp.tile'd (1, L) parameter row lines up with the repeating
        # weight/bias pattern on every row).
        L = lcm
        while L * 2 <= 1024:
            L *= 2
        rows = -(-total // L)
        tile_rows = max(sub, min((target_tile_bytes // (L * itemsize)) // sub * sub,
                                 _round_up(rows, sub)))
        rows_padded = _round_up(rows, tile_rows)
        padded_total = rows_padded * L

        x_flat = x2.reshape(total)
        if padded_total != total:
            x_flat = jnp.pad(x_flat, (0, padded_total - total))
        x_lanes = x_flat.reshape(rows_padded, L)

        reps = L // D
        w_row = jnp.tile(weight, reps).reshape(1, L)
        b_row = jnp.tile(bias, reps).reshape(1, L)

        out = pl.pallas_call(
            _affine_kernel,
            out_shape=jax.ShapeDtypeStruct((rows_padded, L), out_dtype),
            grid_spec=pltpu.PrefetchScalarGridSpec(
                num_scalar_prefetch=0,
                grid=(rows_padded // tile_rows,),
                in_specs=[
                    pl.BlockSpec((tile_rows, L), lambda i: (i, 0)),
                    pl.BlockSpec((1, L), lambda i: (0, 0)),
                    pl.BlockSpec((1, L), lambda i: (0, 0)),
                ],
                out_specs=pl.BlockSpec((tile_rows, L), lambda i: (i, 0)),
            ),
            compiler_params=pltpu.CompilerParams(
                dimension_semantics=("parallel",),
            ),
        )(x_lanes, w_row, b_row)
        return out.reshape(padded_total)[:total].reshape(orig_shape)

    # ---- Path B: (B, D) tiling -----------------------------------------
    # Used when D is already a multiple of 128 (lane-dense as-is), or when the
    # re-pack period lcm(D, 128) is too large to be worth it (full-D blocks are
    # always a legal block shape).
    if lane_ok:
        tile_d = min(D, 512)
        while D % tile_d != 0:
            tile_d -= 128
    else:
        tile_d = D  # full-extent last-dim block is always legal

    tile_b = max(sub, min((target_tile_bytes // (tile_d * itemsize)) // sub * sub,
                          _round_up(B, sub)))
    B_padded = _round_up(B, tile_b)
    if B_padded != B:
        x2 = jnp.pad(x2, ((0, B_padded - B), (0, 0)))

    w2 = weight.reshape(1, D)
    b2 = bias.reshape(1, D)

    out = pl.pallas_call(
        _affine_kernel,
        out_shape=jax.ShapeDtypeStruct((B_padded, D), out_dtype),
        grid_spec=pltpu.PrefetchScalarGridSpec(
            num_scalar_prefetch=0,
            grid=(B_padded // tile_b, D // tile_d),
            in_specs=[
                pl.BlockSpec((tile_b, tile_d), lambda i, j: (i, j)),
                pl.BlockSpec((1, tile_d), lambda i, j: (0, j)),
                pl.BlockSpec((1, tile_d), lambda i, j: (0, j)),
            ],
            out_specs=pl.BlockSpec((tile_b, tile_d), lambda i, j: (i, j)),
        ),
        compiler_params=pltpu.CompilerParams(
            dimension_semantics=("parallel", "parallel"),
        ),
    )(x2, w2, b2)
    return out[:B].reshape(orig_shape)


if __name__ == "__main__":
    key = jax.random.PRNGKey(0)

    # Deterministic parameter init matching Diagonal.__init__ (ones / zeros),
    # perturbed deterministically so the affine is nontrivial.
    def make_params(dim):
        k_w, k_b = jax.random.split(jax.random.PRNGKey(42))
        w = jnp.ones((dim,), jnp.float32) + 0.1 * jax.random.normal(k_w, (dim,), jnp.float32)
        b = jnp.zeros((dim,), jnp.float32) + 0.1 * jax.random.normal(k_b, (dim,), jnp.float32)
        return w, b

    # Case 1: small dim (32) -> lane-dense flatten path.
    k1, k2, k3 = jax.random.split(key, 3)
    x1 = jax.random.normal(k1, (8, 32), dtype=jnp.float32)
    w1, b1 = make_params(32)
    y1 = jax.block_until_ready(classifier_forward(x1, w1, b1))
    assert jnp.allclose(y1, x1 * w1[None, :] + b1[None, :], atol=1e-6, rtol=1e-6)

    # Case 2: lane-friendly dim (256) with ragged batch (10) -> 2D-tiled path.
    x2 = jax.random.normal(k2, (10, 256), dtype=jnp.float32)
    w2, b2 = make_params(256)
    y2 = jax.block_until_ready(classifier_forward(x2, w2, b2))
    assert jnp.allclose(y2, x2 * w2[None, :] + b2[None, :], atol=1e-6, rtol=1e-6)

    # Case 3: extra leading dims, small dim -> reshape + lane-dense path.
    x3 = jax.random.normal(k3, (2, 5, 32), dtype=jnp.float32)
    y3 = jax.block_until_ready(classifier_forward(x3, w1, b1))
    assert jnp.allclose(y3, x3 * w1 + b1, atol=1e-6, rtol=1e-6)

    print("KERNEL_OK")
</pallas_src>

<mosaic_0001>
module attributes {stable_mosaic.version = 11 : i64} {
  func.func @_affine_kernel(%arg0: i32, %arg1: memref<8x1024xf32, #tpu.memory_space<vmem>>, %arg2: memref<1x1024xf32, #tpu.memory_space<vmem>>, %arg3: memref<1x1024xf32, #tpu.memory_space<vmem>>, %arg4: memref<8x1024xf32, #tpu.memory_space<vmem>>) attributes {dimension_semantics = [#tpu.dimension_semantics<parallel>], iteration_bounds = array<i64: 1>, scalar_prefetch = 0 : i64, scratch_operands = 0 : i64, tpu.core_type = #tpu.core_type<tc>, window_params = [{transform_indices = @transform_0, window_bounds = array<i64: 8, 1024>}, {pipeline_mode = #tpu.pipeline_mode<synchronous>, transform_indices = @transform_1, window_bounds = array<i64: 1, 1024>}, {pipeline_mode = #tpu.pipeline_mode<synchronous>, transform_indices = @transform_2, window_bounds = array<i64: 1, 1024>}, {transform_indices = @transform_3, window_bounds = array<i64: 8, 1024>}]} {
    %c0 = arith.constant 0 : index
    %c0_0 = arith.constant 0 : index
    %0 = vector.load %arg1[%c0, %c0_0] : memref<8x1024xf32, #tpu.memory_space<vmem>>, vector<8x1024xf32>
    %c0_1 = arith.constant 0 : index
    %c0_2 = arith.constant 0 : index
    %1 = vector.load %arg2[%c0_1, %c0_2] : memref<1x1024xf32, #tpu.memory_space<vmem>>, vector<1x1024xf32>
    %2 = vector.broadcast %1 : vector<1x1024xf32> to vector<8x1024xf32>
    %3 = arith.mulf %0, %2 : vector<8x1024xf32>
    %c0_3 = arith.constant 0 : index
    %c0_4 = arith.constant 0 : index
    %4 = vector.load %arg3[%c0_3, %c0_4] : memref<1x1024xf32, #tpu.memory_space<vmem>>, vector<1x1024xf32>
    %5 = vector.broadcast %4 : vector<1x1024xf32> to vector<8x1024xf32>
    %6 = arith.addf %3, %5 : vector<8x1024xf32>
    %c0_5 = arith.constant 0 : index
    %c0_6 = arith.constant 0 : index
    %7 = vector.load %arg4[%c0_5, %c0_6] : memref<8x1024xf32, #tpu.memory_space<vmem>>, vector<8x1024xf32>
    tpu.vector_store %arg4[%c0_5, %c0_6], %6 {strides = array<i32>} : memref<8x1024xf32, #tpu.memory_space<vmem>>, vector<8x1024xf32>,
    return
  }
  func.func @transform_0(%arg0: i32) -> (i32, i32) {
    %c0_i32 = arith.constant 0 : i32
    %c0_i32_0 = arith.constant 0 : i32
    return %arg0, %c0_i32 : i32, i32
  }
  func.func @transform_1(%arg0: i32) -> (i32, i32) {
    %c0_i32 = arith.constant 0 : i32
    %c0_i32_0 = arith.constant 0 : i32
    %c0_i32_1 = arith.constant 0 : i32
    return %c0_i32, %c0_i32_0 : i32, i32
  }
  func.func @transform_2(%arg0: i32) -> (i32, i32) {
    %c0_i32 = arith.constant 0 : i32
    %c0_i32_0 = arith.constant 0 : i32
    %c0_i32_1 = arith.constant 0 : i32
    return %c0_i32, %c0_i32_0 : i32, i32
  }
  func.func @transform_3(%arg0: i32) -> (i32, i32) {
    %c0_i32 = arith.constant 0 : i32
    %c0_i32_0 = arith.constant 0 : i32
    return %arg0, %c0_i32 : i32, i32
  }
}

</mosaic_0001>

<bundles_post_ra>
// kernel: tpu_custom_call.1
= control target key start
LH: loop header
LB: loop body
LE: loop exit
PB: predicated region body
PF: predicated region fallthrough
CT: control target
= control target key end

     0   :  { %8 = vsyncpa [#allocation3], 0  ;;  %s284_s0 = inlined_call_operand.hbm [shape: f32[8,1024], index: 0, kind: input, shape index: {}]   ;;  %s285_s1 = inlined_call_operand.hbm [shape: f32[1,1024], index: 1, kind: input, shape index: {}]   ;;  %s286_s2 = inlined_call_operand.hbm [shape: f32[1,1024], index: 2, kind: input, shape index: {}]   ;;  %s287_s3 = inlined_call_operand.hbm [shape: f32[8,1024], index: 3, kind: output, shape index: {}]  }
   0x1   :  { %9 = vsyncpa [#allocation6], 0  ;;  %s27_s14 = sshll.u32 %s285_s1, 4  ;;  %s28_s14 = int_to_ptr.hbm [resolvable:$true] %s27_s14 }
   0x2   :  { %10 = vsyncpa [#allocation4], 0  ;;  %s248_s15 = smov [#allocation5]   ;;  %s16_s19 = sshll.u32 %s284_s0, 4  ;;  %s17_s19 = int_to_ptr.hbm [resolvable:$true] %s16_s19 }
   0x3   :  { %s29_s16 = sshll.u32 %s248_s15, 4  ;;  %s249_s20 = smov [#allocation2]   ;;  %s30_s16 = int_to_ptr.vmem [resolvable:$true] %s29_s16 }
   0x4   :  { %32 = dma.hbm_to_vmem [thread:$0]  %s28_s14, 128, %s30_s16, [#allocation6]  }
   0x5   :  { %s18_s21 = sshll.u32 %s249_s20, 4  ;;  %s38_s24 = sshll.u32 %s286_s2, 4  ;;  %s19_s21 = int_to_ptr.vmem [resolvable:$true] %s18_s21  ;;  %s39_s24 = int_to_ptr.hbm [resolvable:$true] %s38_s24 }
   0x6   :  { %21 = dma.hbm_to_vmem [thread:$0]  %s17_s19, 1024, %s19_s21, [#allocation3]  }
   0x7   :  { %s250_s1 = smov [#allocation7]  }
   0x8   :  { %s40_s25 = sshll.u32 %s250_s1, 4  ;;  %s41_s25 = int_to_ptr.vmem [resolvable:$true] %s40_s25 }
   0x9   :  { %43 = dma.hbm_to_vmem [thread:$0]  %s39_s24, 128, %s41_s25, [#allocation6]  }
   0xa   :  { %242 = dma.done.wait [#allocation3], 1024  }
   0xb   :  { %243 = vsyncadd [#allocation3], 4294966272 }
   0xc   :  { %244 = dma.done.wait [#allocation6], 256  }
   0xd   :  { %245 = vsyncadd [#allocation6], 4294967040  ;;  %v56_v0 = vld [vmem:[#allocation2] sm:$0xff]  ;;  %v90_v2 = vld [vmem:[#allocation7] sm:$0xff]  ;;  %s251_s0 = smov [#allocation8]   ;;  %s131_s28 = sshll.u32 %s287_s3, 4  ;;  %s132_s28 = int_to_ptr.hbm [resolvable:$true] %s131_s28 }
   0xe   :  { %v64_v1 = vld [vmem:[#allocation5] sm:$0xff]  ;;  %v92_v4 = vperm.slane %v90_v2, 0  ;;  %v57_v5 = vld [vmem:[#allocation2 + $0x8] sm:$0xff]  ;;  %v93_v7 = vperm.slane %v90_v2, 1  ;;  %v58_v8 = vld [vmem:[#allocation2 + $0x10] sm:$0xff]  ;;  %v94_v10 = vperm.slane %v90_v2, 2 }
   0xf   :  { %v66_v3 = vperm.slane %v64_v1, 0  ;;  %v67_v6 = vperm.slane %v64_v1, 1  ;;  %v68_v9 = vperm.slane %v64_v1, 2  ;;  %v59_v11 = vld [vmem:[#allocation2 + $0x18] sm:$0xff]  ;;  %v69_v12 = vperm.slane %v64_v1, 3  ;;  %v60_v14 = vld [vmem:[#allocation2 + $0x20] sm:$0xff] }
  0x10   :  { %v95_v13 = vperm.slane %v90_v2, 3  ;;  %v70_v17 = vperm.slane %v64_v1, 4  ;;  %v96_v18 = vperm.slane %v90_v2, 4  ;;  %v61_v19 = vld [vmem:[#allocation2 + $0x28] sm:$0xff]  ;;  %v71_v22 = vperm.slane %v64_v1, 5  ;;  %v62_v24 = vld [vmem:[#allocation2 + $0x30] sm:$0xff] }
  0x11   :  { %v82_v15 = vmul.f32 %v66_v3, %v56_v0  ;;  %v83_v16 = vmul.f32 %v67_v6, %v57_v5  ;;  %v84_v20 = vmul.f32 %v68_v9, %v58_v8  ;;  %v85_v21 = vmul.f32 %v69_v12, %v59_v11  ;;  %v63_v33 = vld [vmem:[#allocation2 + $0x38] sm:$0xff]  ;;  %s129_s2 = sshll.u32 %s251_s0, 4  ;;  %s130_s2 = int_to_ptr.vmem [resolvable:$true] %s129_s2 }
  0x12   :  { %v97_v23 = vperm.slane %v90_v2, 5  ;;  %v86_v27 = vmul.f32 %v70_v17, %v60_v14  ;;  %v72_v28 = vperm.slane %v64_v1, 6  ;;  %v87_v31 = vmul.f32 %v71_v22, %v61_v19 }
  0x13   :  { %v108_v25 = vadd.f32 %v92_v4, %v82_v15  ;;  %v109_v26 = vadd.f32 %v93_v7, %v83_v16  ;;  %v110_v29 = vadd.f32 %v94_v10, %v84_v20  ;;  %v111_v30 = vadd.f32 %v95_v13, %v85_v21 }
  0x14   :  { %v98_v32 = vperm.slane %v90_v2, 6  ;;  %v112_v34 = vadd.f32 %v96_v18, %v86_v27  ;;  %v88_v35 = vmul.f32 %v72_v28, %v62_v24  ;;  %v73_v36 = vperm.slane %v64_v1, 7 }
  0x15   :  { %116 = vst [vmem:[#allocation8] sm:$0xff] %v108_v25  ;;  %v99_v37 = vperm.slane %v90_v2, 7  ;;  %v113_v38 = vadd.f32 %v97_v23, %v87_v31 }
  0x16   :  { %117 = vst [vmem:[#allocation8 + $0x8] sm:$0xff] %v109_v26  ;;  %v114_v39 = vadd.f32 %v98_v32, %v88_v35  ;;  %v89_v40 = vmul.f32 %v73_v36, %v63_v33 }
  0x17   :  { %118 = vst [vmem:[#allocation8 + $0x10] sm:$0xff] %v110_v29 }
  0x18   :  { %119 = vst [vmem:[#allocation8 + $0x18] sm:$0xff] %v111_v30  ;;  %v115_v41 = vadd.f32 %v99_v37, %v89_v40 }
  0x19   :  { %120 = vst [vmem:[#allocation8 + $0x20] sm:$0xff] %v112_v34 }
  0x1a   :  { %121 = vst [vmem:[#allocation8 + $0x28] sm:$0xff] %v113_v38 }
  0x1b   :  { %122 = vst [vmem:[#allocation8 + $0x30] sm:$0xff] %v114_v39 }
  0x1c   :  { %123 = vst [vmem:[#allocation8 + $0x38] sm:$0xff] %v115_v41 }
  0x1d   :  { %134 = dma.vmem_to_hbm [thread:$0]  %s130_s2, 1024, %s132_s28, [#allocation4]  }
  0x1e   :  { %246 = dma.done.wait [#allocation4], 1024  }
  0x1f   :  { %247 = vsyncadd [#allocation4], 4294966272 }
  0x20   :  { %139 = vsyncpa [#allocation3], 1 }
  0x21   :  { %140 = vsyncpa [#allocation6], 1 }
  0x22   :  { %141 = vsyncpa [#allocation4], 1 }

</bundles_post_ra>
